<compile_context>
chip_gen: v7x
topology: tpu7x:2x2x1
jax: 0.10.0
libtpu: 0.0.40
codegen_flags: <defaults>
</compile_context>

<pallas_src>
import functools

import jax
import jax.numpy as jnp
from jax.experimental import pallas as pl
from jax.experimental.pallas import tpu as pltpu


# ---------------------------------------------------------------------------
# in-kernel helpers (trace into the kernel body)
# ---------------------------------------------------------------------------
def _layernorm(x, w, b, eps=1e-5):
    mu = jnp.mean(x, axis=-1, keepdims=True)
    var = jnp.mean(jnp.square(x - mu), axis=-1, keepdims=True)
    return (x - mu) * jax.lax.rsqrt(var + eps) * w + b


def _gelu_exact(x):
    # matches torch.nn.GELU() default (erf-based, not tanh approximation)
    return 0.5 * x * (1.0 + jax.lax.erf(x * 0.7071067811865476))


# ---------------------------------------------------------------------------
# Pallas kernel: (block_b, L, C) activations per grid step, weights resident
# ---------------------------------------------------------------------------
def block_kernel(x_ref, ln1w_ref, ln1b_ref,
                 wqkv_ref, bqkv_ref, wproj_ref, bproj_ref,
                 ln2w_ref, ln2b_ref,
                 wfc1_ref, bfc1_ref, wfc2_ref, bfc2_ref,
                 g1_ref, g2_ref,
                 out_ref, *, num_heads):
    x = x_ref[...].astype(jnp.float32)               # (Bt, L, C) f32
    Bt, L, C = x.shape
    H = num_heads
    D = C // H
    scale = float(D) ** -0.5                          # SDPA default scale

    # ---------------- attention branch ----------------
    h = _layernorm(x, ln1w_ref[0], ln1b_ref[0])       # f32 (Bt, L, C)
    h2 = h.reshape(Bt * L, C).astype(jnp.bfloat16)

    # single fused QKV matmul (bf16 operands, f32 accumulation) + bias
    qkv = (jnp.dot(h2, wqkv_ref[...], preferred_element_type=jnp.float32)
           + bqkv_ref[0])                             # (Bt*L, 3C) f32

    # split + cast ONCE (q pre-scaled in f32 == scaling the scores)
    q = (qkv[:, 0:C] * scale).astype(jnp.bfloat16).reshape(Bt, L, C)
    k = qkv[:, C:2 * C].astype(jnp.bfloat16).reshape(Bt, L, C)
    v = qkv[:, 2 * C:3 * C].astype(jnp.bfloat16).reshape(Bt, L, C)

    wproj = wproj_ref[...]                            # (C, C) bf16, loaded once

    # Per-head attention. The output projection is accumulated per head
    # (o_h @ wproj[h*D:(h+1)*D, :]) so every accumulate is full C-lane wide:
    # no lane-partial stores, no scratch slab, no post-loop concatenate.
    a = jnp.zeros((Bt * L, C), jnp.float32)
    for hd in range(H):
        lo = hd * D
        hi = lo + D
        qs = q[:, :, lo:hi]                           # (Bt, L, D) bf16
        ks = k[:, :, lo:hi]
        vs = v[:, :, lo:hi]
        # batched dot_generals contracting the last dims (no explicit k.T)
        s = jnp.einsum('bqd,bkd->bqk', qs, ks,
                       preferred_element_type=jnp.float32)      # (Bt, L, L) f32
        m = jnp.max(s, axis=-1, keepdims=True)
        e = jnp.exp(s - m)
        p = e * pl.reciprocal(jnp.sum(e, axis=-1, keepdims=True), approx=True)
        o = jnp.einsum('bqk,bkd->bqd', p.astype(jnp.bfloat16), vs,
                       preferred_element_type=jnp.float32)      # (Bt, L, D) f32
        a = a + jnp.dot(o.reshape(Bt * L, D).astype(jnp.bfloat16),
                        wproj[lo:hi, :],
                        preferred_element_type=jnp.float32)     # (Bt*L, C) f32
    a = a + bproj_ref[0]
    x1 = x + g1_ref[0] * a.reshape(Bt, L, C)          # gamma_1 layer-scale residual

    # ---------------- MLP branch ----------------
    hm = _layernorm(x1, ln2w_ref[0], ln2b_ref[0]).reshape(Bt * L, C)
    hm = hm.astype(jnp.bfloat16)
    m1 = (jnp.dot(hm, wfc1_ref[...], preferred_element_type=jnp.float32)
          + bfc1_ref[0])
    m1 = _gelu_exact(m1).astype(jnp.bfloat16)
    m2 = (jnp.dot(m1, wfc2_ref[...], preferred_element_type=jnp.float32)
          + bfc2_ref[0])
    out_ref[...] = (x1 + g2_ref[0] * m2.reshape(Bt, L, C)).astype(out_ref.dtype)


# ---------------------------------------------------------------------------
# wrapper helpers
# ---------------------------------------------------------------------------
def _vmem_capacity_bytes():
    """Per-core VMEM capacity; conservative (v7x) fallback if unavailable."""
    try:
        return int(pltpu.get_tpu_info().vmem_capacity_bytes)
    except Exception:
        return 64 * 1024 * 1024


def _choose_block_b(B, L, vmem_cap_bytes):
    """Rows per grid step: as many as a generation-aware cap allows, while
    keeping >= 2 grid steps (when B >= 2) so v7x's two TensorCores both get
    work through the 'parallel' grid axis."""
    row_cap = 2048 if vmem_cap_bytes >= 96 * 1024 * 1024 else 1024
    best = 1
    for cand in range(1, B + 1):
        if B % cand:
            continue
        if cand * L > row_cap:
            continue
        if B >= 2 and B // cand < 2:
            continue
        best = cand
    return best


def prepare_block_params(params):
    """One-time parameter preparation (weight bf16 casts for the MXU).
    Call this ONCE; do not pay the HBM read+write of every weight on every
    forward call."""
    bf16 = jnp.bfloat16
    return (
        params["ln1_w"], params["ln1_b"],
        params["w_qkv"].astype(bf16), params["b_qkv"],
        params["w_proj"].astype(bf16), params["b_proj"],
        params["ln2_w"], params["ln2_b"],
        params["w_fc1"].astype(bf16), params["b_fc1"],
        params["w_fc2"].astype(bf16), params["b_fc2"],
        params["gamma_1"], params["gamma_2"],
    )


def transformer_block(x, prepared, num_heads, block_b=None):
    B, L, C = x.shape
    assert C % num_heads == 0, "bert_n_emb must be divisible by bert_n_head"
    # NOTE: for real deployments keep C a multiple of 128 and block_b*L a
    # multiple of 8 so every load/store is lane/sublane dense.

    vmem_cap = _vmem_capacity_bytes()
    if block_b is None:
        block_b = _choose_block_b(B, L, vmem_cap)
    assert B % block_b == 0
    grid_b = B // block_b

    def const_spec(arr):
        n = arr.ndim
        # grid-invariant index_map -> DMA'd once, reused every grid step
        return pl.BlockSpec(arr.shape, lambda i, n=n: (0,) * n)

    in_specs = [pl.BlockSpec((block_b, L, C), lambda i: (i, 0, 0))] + [
        const_spec(p) for p in prepared
    ]
    out_spec = pl.BlockSpec((block_b, L, C), lambda i: (i, 0, 0))

    # ---- VMEM budget: derive the limit from the actual requirement --------
    weight_bytes = sum(int(p.size) * p.dtype.itemsize for p in prepared)
    act_block_bytes = block_b * L * C * x.dtype.itemsize
    rows = block_b * L
    # working set: qkv f32 (12C) + q/k/v bf16 (6C) + proj acc f32 (4C) +
    # mlp hidden f32+bf16 (16C+8C) + x/x1 f32 (8C) + a few (rows, L) f32 scores
    work_bytes = rows * C * (12 + 6 + 4 + 16 + 8 + 8) + 3 * rows * L * 4
    needed = 2 * weight_bytes + 4 * act_block_bytes + work_bytes
    vmem_limit = int(min(max(needed * 3 // 2, 32 * 1024 * 1024),
                         (vmem_cap * 3) // 4))

    x_bytes = int(x.size) * x.dtype.itemsize
    cost = pl.CostEstimate(
        flops=2 * B * L * C * 12 * C + 4 * B * L * L * C,
        transcendentals=B * num_heads * L * L + 4 * B * L * C,
        bytes_accessed=2 * x_bytes + weight_bytes,
    )

    return pl.pallas_call(
        functools.partial(block_kernel, num_heads=num_heads),
        out_shape=jax.ShapeDtypeStruct((B, L, C), x.dtype),
        grid_spec=pltpu.PrefetchScalarGridSpec(
            num_scalar_prefetch=0,
            grid=(grid_b,),
            in_specs=in_specs,
            out_specs=out_spec,
        ),
        compiler_params=pltpu.CompilerParams(
            dimension_semantics=("parallel",),
            vmem_limit_bytes=vmem_limit,
        ),
        cost_estimate=cost,
    )(x, *prepared)


# ---------------------------------------------------------------------------
# pure-JAX reference (mirrors the PyTorch forward exactly, f32)
# ---------------------------------------------------------------------------
def reference_block(x, p, num_heads):
    B, L, C = x.shape
    D = C // num_heads

    def ln(y, w, b, eps=1e-5):
        mu = jnp.mean(y, axis=-1, keepdims=True)
        var = jnp.mean(jnp.square(y - mu), axis=-1, keepdims=True)
        return (y - mu) / jnp.sqrt(var + eps) * w[0] + b[0]

    h = ln(x, p["ln1_w"], p["ln1_b"])
    qkv = h @ p["w_qkv"] + p["b_qkv"][0]
    qkv = qkv.reshape(B, L, 3, num_heads, D).transpose(2, 0, 3, 1, 4)
    q, k, v = qkv[0], qkv[1], qkv[2]
    s = jnp.einsum("bhld,bhmd->bhlm", q, k) * (float(D) ** -0.5)
    attn = jax.nn.softmax(s, axis=-1)
    a = jnp.einsum("bhlm,bhmd->bhld", attn, v)
    a = a.transpose(0, 2, 1, 3).reshape(B, L, C)
    a = a @ p["w_proj"] + p["b_proj"][0]
    x1 = x + p["gamma_1"][0] * a

    h2 = ln(x1, p["ln2_w"], p["ln2_b"])
    m = jax.nn.gelu(h2 @ p["w_fc1"] + p["b_fc1"][0], approximate=False)
    m = m @ p["w_fc2"] + p["b_fc2"][0]
    return x1 + p["gamma_2"][0] * m


# ---------------------------------------------------------------------------
# deterministic parameter construction (shapes from Block.__init__)
# ---------------------------------------------------------------------------
def make_params(key, n_emb):
    ks = jax.random.split(key, 8)
    f32 = jnp.float32
    return {
        # LayerNorm: torch default init (weight=1, bias=0)
        "ln1_w": jnp.ones((1, n_emb), f32),
        "ln1_b": jnp.zeros((1, n_emb), f32),
        "ln2_w": jnp.ones((1, n_emb), f32),
        "ln2_b": jnp.zeros((1, n_emb), f32),
        # Attention
        "w_qkv": 0.02 * jax.random.normal(ks[0], (n_emb, 3 * n_emb), f32),
        "b_qkv": jnp.zeros((1, 3 * n_emb), f32),            # zeroed in __init__
        "w_proj": 0.02 * jax.random.normal(ks[1], (n_emb, n_emb), f32),
        "b_proj": 0.01 * jax.random.normal(ks[2], (1, n_emb), f32),
        # MLP
        "w_fc1": 0.02 * jax.random.normal(ks[3], (n_emb, 4 * n_emb), f32),
        "b_fc1": 0.01 * jax.random.normal(ks[4], (1, 4 * n_emb), f32),
        "w_fc2": 0.02 * jax.random.normal(ks[5], (4 * n_emb, n_emb), f32),
        "b_fc2": 0.01 * jax.random.normal(ks[6], (1, n_emb), f32),
        # layer-scale gammas: init_values * ones
        "gamma_1": jnp.ones((1, n_emb), f32),
        "gamma_2": jnp.ones((1, n_emb), f32),
    }


if __name__ == "__main__":
    B, L, C = 2, 8, 32          # batch, sequence, bert_n_emb
    num_heads = 4               # bert_n_head

    key = jax.random.PRNGKey(0)
    kx, kp = jax.random.split(key)
    x = jax.random.normal(kx, (B, L, C), jnp.float32)
    params = make_params(kp, C)

    prepared = prepare_block_params(params)     # one-time weight prep (bf16)
    out = transformer_block(x, prepared, num_heads)
    out = jax.block_until_ready(out)

    ref = reference_block(x, params, num_heads)
    assert out.shape == (B, L, C)
    # tolerance accounts for bf16 MXU operands (f32 accumulation) and the
    # approximate softmax reciprocal.
    assert jnp.allclose(out, ref, atol=3e-2, rtol=3e-2), "mismatch vs reference"

    print("KERNEL_OK")
</pallas_src>

<mosaic_0001>
module attributes {stable_mosaic.version = 11 : i64} {
  func.func @block_kernel(%arg0: i32, %arg1: memref<1x8x32xf32, #tpu.memory_space<vmem>>, %arg2: memref<1x32xf32, #tpu.memory_space<vmem>>, %arg3: memref<1x32xf32, #tpu.memory_space<vmem>>, %arg4: memref<32x96xbf16, #tpu.memory_space<vmem>>, %arg5: memref<1x96xf32, #tpu.memory_space<vmem>>, %arg6: memref<32x32xbf16, #tpu.memory_space<vmem>>, %arg7: memref<1x32xf32, #tpu.memory_space<vmem>>, %arg8: memref<1x32xf32, #tpu.memory_space<vmem>>, %arg9: memref<1x32xf32, #tpu.memory_space<vmem>>, %arg10: memref<32x128xbf16, #tpu.memory_space<vmem>>, %arg11: memref<1x128xf32, #tpu.memory_space<vmem>>, %arg12: memref<128x32xbf16, #tpu.memory_space<vmem>>, %arg13: memref<1x32xf32, #tpu.memory_space<vmem>>, %arg14: memref<1x32xf32, #tpu.memory_space<vmem>>, %arg15: memref<1x32xf32, #tpu.memory_space<vmem>>, %arg16: memref<1x8x32xf32, #tpu.memory_space<vmem>>) attributes {dimension_semantics = [#tpu.dimension_semantics<parallel>], iteration_bounds = array<i64: 2>, scalar_prefetch = 0 : i64, scratch_operands = 0 : i64, tpu.core_type = #tpu.core_type<tc>, window_params = [{transform_indices = @transform_0, window_bounds = array<i64: 1, 8, 32>}, {pipeline_mode = #tpu.pipeline_mode<synchronous>, transform_indices = @transform_1, window_bounds = array<i64: 1, 32>}, {pipeline_mode = #tpu.pipeline_mode<synchronous>, transform_indices = @transform_2, window_bounds = array<i64: 1, 32>}, {pipeline_mode = #tpu.pipeline_mode<synchronous>, transform_indices = @transform_3, window_bounds = array<i64: 32, 96>}, {pipeline_mode = #tpu.pipeline_mode<synchronous>, transform_indices = @transform_4, window_bounds = array<i64: 1, 96>}, {pipeline_mode = #tpu.pipeline_mode<synchronous>, transform_indices = @transform_5, window_bounds = array<i64: 32, 32>}, {pipeline_mode = #tpu.pipeline_mode<synchronous>, transform_indices = @transform_6, window_bounds = array<i64: 1, 32>}, {pipeline_mode = #tpu.pipeline_mode<synchronous>, transform_indices = @transform_7, window_bounds = array<i64: 1, 32>}, {pipeline_mode = #tpu.pipeline_mode<synchronous>, transform_indices = @transform_8, window_bounds = array<i64: 1, 32>}, {pipeline_mode = #tpu.pipeline_mode<synchronous>, transform_indices = @transform_9, window_bounds = array<i64: 32, 128>}, {pipeline_mode = #tpu.pipeline_mode<synchronous>, transform_indices = @transform_10, window_bounds = array<i64: 1, 128>}, {pipeline_mode = #tpu.pipeline_mode<synchronous>, transform_indices = @transform_11, window_bounds = array<i64: 128, 32>}, {pipeline_mode = #tpu.pipeline_mode<synchronous>, transform_indices = @transform_12, window_bounds = array<i64: 1, 32>}, {pipeline_mode = #tpu.pipeline_mode<synchronous>, transform_indices = @transform_13, window_bounds = array<i64: 1, 32>}, {pipeline_mode = #tpu.pipeline_mode<synchronous>, transform_indices = @transform_14, window_bounds = array<i64: 1, 32>}, {transform_indices = @transform_15, window_bounds = array<i64: 1, 8, 32>}]} {
    %c0 = arith.constant 0 : index
    %c0_0 = arith.constant 0 : index
    %c0_1 = arith.constant 0 : index
    %0 = vector.load %arg1[%c0, %c0_0, %c0_1] : memref<1x8x32xf32, #tpu.memory_space<vmem>>, vector<1x8x32xf32>
    %c0_2 = arith.constant 0 : index
    %c0_3 = arith.constant 0 : index
    %1 = vector.load %arg2[%c0_2, %c0_3] : memref<1x32xf32, #tpu.memory_space<vmem>>, vector<1x32xf32>
    %2 = vector.shape_cast %1 : vector<1x32xf32> to vector<32xf32>
    %c0_4 = arith.constant 0 : index
    %c0_5 = arith.constant 0 : index
    %3 = vector.load %arg3[%c0_4, %c0_5] : memref<1x32xf32, #tpu.memory_space<vmem>>, vector<1x32xf32>
    %4 = vector.shape_cast %3 : vector<1x32xf32> to vector<32xf32>
    %cst = arith.constant dense<0.000000e+00> : vector<1x8xf32>
    %5 = vector.multi_reduction <add>, %0, %cst [2] : vector<1x8x32xf32> to vector<1x8xf32>
    %6 = vector.shape_cast %5 : vector<1x8xf32> to vector<1x8x1xf32>
    %cst_6 = arith.constant 3.200000e+01 : f32
    %7 = vector.broadcast %cst_6 : f32 to vector<1x8x1xf32>
    %8 = arith.divf %6, %7 : vector<1x8x1xf32>
    %9 = vector.broadcast %8 : vector<1x8x1xf32> to vector<1x8x32xf32>
    %10 = arith.subf %0, %9 : vector<1x8x32xf32>
    %11 = arith.mulf %10, %10 : vector<1x8x32xf32>
    %cst_7 = arith.constant dense<0.000000e+00> : vector<1x8xf32>
    %12 = vector.multi_reduction <add>, %11, %cst_7 [2] : vector<1x8x32xf32> to vector<1x8xf32>
    %13 = vector.shape_cast %12 : vector<1x8xf32> to vector<1x8x1xf32>
    %cst_8 = arith.constant 3.200000e+01 : f32
    %14 = vector.broadcast %cst_8 : f32 to vector<1x8x1xf32>
    %15 = arith.divf %13, %14 : vector<1x8x1xf32>
    %16 = vector.broadcast %8 : vector<1x8x1xf32> to vector<1x8x32xf32>
    %17 = arith.subf %0, %16 : vector<1x8x32xf32>
    %cst_9 = arith.constant 9.99999974E-6 : f32
    %18 = vector.broadcast %cst_9 : f32 to vector<1x8x1xf32>
    %19 = arith.addf %15, %18 : vector<1x8x1xf32>
    %20 = math.rsqrt %19 : vector<1x8x1xf32>
    %21 = vector.broadcast %20 : vector<1x8x1xf32> to vector<1x8x32xf32>
    %22 = arith.mulf %17, %21 : vector<1x8x32xf32>
    %23 = vector.shape_cast %2 : vector<32xf32> to vector<1x1x32xf32>
    %24 = vector.broadcast %23 : vector<1x1x32xf32> to vector<1x8x32xf32>
    %25 = arith.mulf %22, %24 : vector<1x8x32xf32>
    %26 = vector.shape_cast %4 : vector<32xf32> to vector<1x1x32xf32>
    %27 = vector.broadcast %26 : vector<1x1x32xf32> to vector<1x8x32xf32>
    %28 = arith.addf %25, %27 : vector<1x8x32xf32>
    %29 = vector.shape_cast %28 : vector<1x8x32xf32> to vector<8x32xf32>
    %30 = arith.truncf %29 : vector<8x32xf32> to vector<8x32xbf16>
    %c0_10 = arith.constant 0 : index
    %c0_11 = arith.constant 0 : index
    %31 = vector.load %arg4[%c0_10, %c0_11] : memref<32x96xbf16, #tpu.memory_space<vmem>>, vector<32x96xbf16>
    %cst_12 = arith.constant dense<0.000000e+00> : vector<8x96xf32>
    %32 = tpu.matmul %30, %31, %cst_12 {dimension_numbers = #tpu.dot_dimension_numbers<[1], [0], [0], [1], [0, 0, 1, 1], [], []>} : vector<8x32xbf16>, vector<32x96xbf16>, vector<8x96xf32> -> vector<8x96xf32>
    %c0_13 = arith.constant 0 : index
    %c0_14 = arith.constant 0 : index
    %33 = vector.load %arg5[%c0_13, %c0_14] : memref<1x96xf32, #tpu.memory_space<vmem>>, vector<1x96xf32>
    %34 = vector.shape_cast %33 : vector<1x96xf32> to vector<96xf32>
    %35 = vector.shape_cast %34 : vector<96xf32> to vector<1x96xf32>
    %36 = vector.broadcast %35 : vector<1x96xf32> to vector<8x96xf32>
    %37 = arith.addf %32, %36 : vector<8x96xf32>
    %38 = vector.extract_strided_slice %37 {offsets = [0, 0], sizes = [8, 32], strides = [1, 1]} : vector<8x96xf32> to vector<8x32xf32>
    %cst_15 = arith.constant 0.353553385 : f32
    %39 = vector.broadcast %cst_15 : f32 to vector<8x32xf32>
    %40 = arith.mulf %38, %39 : vector<8x32xf32>
    %41 = arith.truncf %40 : vector<8x32xf32> to vector<8x32xbf16>
    %42 = vector.shape_cast %41 : vector<8x32xbf16> to vector<1x8x32xbf16>
    %43 = vector.extract_strided_slice %37 {offsets = [0, 32], sizes = [8, 32], strides = [1, 1]} : vector<8x96xf32> to vector<8x32xf32>
    %44 = arith.truncf %43 : vector<8x32xf32> to vector<8x32xbf16>
    %45 = vector.shape_cast %44 : vector<8x32xbf16> to vector<1x8x32xbf16>
    %46 = vector.extract_strided_slice %37 {offsets = [0, 64], sizes = [8, 32], strides = [1, 1]} : vector<8x96xf32> to vector<8x32xf32>
    %47 = arith.truncf %46 : vector<8x32xf32> to vector<8x32xbf16>
    %48 = vector.shape_cast %47 : vector<8x32xbf16> to vector<1x8x32xbf16>
    %c0_16 = arith.constant 0 : index
    %c0_17 = arith.constant 0 : index
    %49 = vector.load %arg6[%c0_16, %c0_17] : memref<32x32xbf16, #tpu.memory_space<vmem>>, vector<32x32xbf16>
    %cst_18 = arith.constant 0.000000e+00 : f32
    %50 = vector.broadcast %cst_18 : f32 to vector<8x32xf32>
    %51 = vector.extract_strided_slice %42 {offsets = [0, 0, 0], sizes = [1, 8, 8], strides = [1, 1, 1]} : vector<1x8x32xbf16> to vector<1x8x8xbf16>
    %52 = vector.extract_strided_slice %45 {offsets = [0, 0, 0], sizes = [1, 8, 8], strides = [1, 1, 1]} : vector<1x8x32xbf16> to vector<1x8x8xbf16>
    %53 = vector.extract_strided_slice %48 {offsets = [0, 0, 0], sizes = [1, 8, 8], strides = [1, 1, 1]} : vector<1x8x32xbf16> to vector<1x8x8xbf16>
    "tpu.trace_start"() <{level = 10 : i32, message = "bqd,bkd->bqk"}> : () -> ()
    %cst_19 = arith.constant dense<0.000000e+00> : vector<1x8x8xf32>
    %54 = tpu.matmul %51, %52, %cst_19 {dimension_numbers = #tpu.dot_dimension_numbers<[2], [2], [1], [1], [0, 0, 0, 1, 1, 1], [0], [0]>} : vector<1x8x8xbf16>, vector<1x8x8xbf16>, vector<1x8x8xf32> -> vector<1x8x8xf32>
    "tpu.trace_stop"() : () -> ()
    %cst_20 = arith.constant dense<0xFF800000> : vector<1x8xf32>
    %55 = vector.multi_reduction <maximumf>, %54, %cst_20 [2] : vector<1x8x8xf32> to vector<1x8xf32>
    %56 = vector.shape_cast %55 : vector<1x8xf32> to vector<1x8x1xf32>
    %57 = vector.broadcast %56 : vector<1x8x1xf32> to vector<1x8x8xf32>
    %58 = arith.subf %54, %57 : vector<1x8x8xf32>
    %59 = math.exp %58 : vector<1x8x8xf32>
    %cst_21 = arith.constant dense<0.000000e+00> : vector<1x8xf32>
    %60 = vector.multi_reduction <add>, %59, %cst_21 [2] : vector<1x8x8xf32> to vector<1x8xf32>
    %61 = vector.shape_cast %60 : vector<1x8xf32> to vector<1x8x1xf32>
    %62 = tpu.reciprocal %61 {approx = true} : vector<1x8x1xf32> -> vector<1x8x1xf32>
    %63 = vector.broadcast %62 : vector<1x8x1xf32> to vector<1x8x8xf32>
    %64 = arith.mulf %59, %63 : vector<1x8x8xf32>
    %65 = arith.truncf %64 : vector<1x8x8xf32> to vector<1x8x8xbf16>
    "tpu.trace_start"() <{level = 10 : i32, message = "bqk,bkd->bqd"}> : () -> ()
    %cst_22 = arith.constant dense<0.000000e+00> : vector<1x8x8xf32>
    %66 = tpu.matmul %65, %53, %cst_22 {dimension_numbers = #tpu.dot_dimension_numbers<[2], [1], [1], [2], [0, 0, 0, 1, 1, 2], [0], [0]>} : vector<1x8x8xbf16>, vector<1x8x8xbf16>, vector<1x8x8xf32> -> vector<1x8x8xf32>
    "tpu.trace_stop"() : () -> ()
    %67 = vector.shape_cast %66 : vector<1x8x8xf32> to vector<8x8xf32>
    %68 = arith.truncf %67 : vector<8x8xf32> to vector<8x8xbf16>
    %69 = vector.extract_strided_slice %49 {offsets = [0, 0], sizes = [8, 32], strides = [1, 1]} : vector<32x32xbf16> to vector<8x32xbf16>
    %cst_23 = arith.constant dense<0.000000e+00> : vector<8x32xf32>
    %70 = tpu.matmul %68, %69, %cst_23 {dimension_numbers = #tpu.dot_dimension_numbers<[1], [0], [0], [1], [0, 0, 1, 1], [], []>} : vector<8x8xbf16>, vector<8x32xbf16>, vector<8x32xf32> -> vector<8x32xf32>
    %71 = arith.addf %50, %70 : vector<8x32xf32>
    %72 = vector.extract_strided_slice %42 {offsets = [0, 0, 8], sizes = [1, 8, 8], strides = [1, 1, 1]} : vector<1x8x32xbf16> to vector<1x8x8xbf16>
    %73 = vector.extract_strided_slice %45 {offsets = [0, 0, 8], sizes = [1, 8, 8], strides = [1, 1, 1]} : vector<1x8x32xbf16> to vector<1x8x8xbf16>
    %74 = vector.extract_strided_slice %48 {offsets = [0, 0, 8], sizes = [1, 8, 8], strides = [1, 1, 1]} : vector<1x8x32xbf16> to vector<1x8x8xbf16>
    "tpu.trace_start"() <{level = 10 : i32, message = "bqd,bkd->bqk"}> : () -> ()
    %cst_24 = arith.constant dense<0.000000e+00> : vector<1x8x8xf32>
    %75 = tpu.matmul %72, %73, %cst_24 {dimension_numbers = #tpu.dot_dimension_numbers<[2], [2], [1], [1], [0, 0, 0, 1, 1, 1], [0], [0]>} : vector<1x8x8xbf16>, vector<1x8x8xbf16>, vector<1x8x8xf32> -> vector<1x8x8xf32>
    "tpu.trace_stop"() : () -> ()
    %cst_25 = arith.constant dense<0xFF800000> : vector<1x8xf32>
    %76 = vector.multi_reduction <maximumf>, %75, %cst_25 [2] : vector<1x8x8xf32> to vector<1x8xf32>
    %77 = vector.shape_cast %76 : vector<1x8xf32> to vector<1x8x1xf32>
    %78 = vector.broadcast %77 : vector<1x8x1xf32> to vector<1x8x8xf32>
    %79 = arith.subf %75, %78 : vector<1x8x8xf32>
    %80 = math.exp %79 : vector<1x8x8xf32>
    %cst_26 = arith.constant dense<0.000000e+00> : vector<1x8xf32>
    %81 = vector.multi_reduction <add>, %80, %cst_26 [2] : vector<1x8x8xf32> to vector<1x8xf32>
    %82 = vector.shape_cast %81 : vector<1x8xf32> to vector<1x8x1xf32>
    %83 = tpu.reciprocal %82 {approx = true} : vector<1x8x1xf32> -> vector<1x8x1xf32>
    %84 = vector.broadcast %83 : vector<1x8x1xf32> to vector<1x8x8xf32>
    %85 = arith.mulf %80, %84 : vector<1x8x8xf32>
    %86 = arith.truncf %85 : vector<1x8x8xf32> to vector<1x8x8xbf16>
    "tpu.trace_start"() <{level = 10 : i32, message = "bqk,bkd->bqd"}> : () -> ()
    %cst_27 = arith.constant dense<0.000000e+00> : vector<1x8x8xf32>
    %87 = tpu.matmul %86, %74, %cst_27 {dimension_numbers = #tpu.dot_dimension_numbers<[2], [1], [1], [2], [0, 0, 0, 1, 1, 2], [0], [0]>} : vector<1x8x8xbf16>, vector<1x8x8xbf16>, vector<1x8x8xf32> -> vector<1x8x8xf32>
    "tpu.trace_stop"() : () -> ()
    %88 = vector.shape_cast %87 : vector<1x8x8xf32> to vector<8x8xf32>
    %89 = arith.truncf %88 : vector<8x8xf32> to vector<8x8xbf16>
    %90 = vector.extract_strided_slice %49 {offsets = [8, 0], sizes = [8, 32], strides = [1, 1]} : vector<32x32xbf16> to vector<8x32xbf16>
    %cst_28 = arith.constant dense<0.000000e+00> : vector<8x32xf32>
    %91 = tpu.matmul %89, %90, %cst_28 {dimension_numbers = #tpu.dot_dimension_numbers<[1], [0], [0], [1], [0, 0, 1, 1], [], []>} : vector<8x8xbf16>, vector<8x32xbf16>, vector<8x32xf32> -> vector<8x32xf32>
    %92 = arith.addf %71, %91 : vector<8x32xf32>
    %93 = vector.extract_strided_slice %42 {offsets = [0, 0, 16], sizes = [1, 8, 8], strides = [1, 1, 1]} : vector<1x8x32xbf16> to vector<1x8x8xbf16>
    %94 = vector.extract_strided_slice %45 {offsets = [0, 0, 16], sizes = [1, 8, 8], strides = [1, 1, 1]} : vector<1x8x32xbf16> to vector<1x8x8xbf16>
    %95 = vector.extract_strided_slice %48 {offsets = [0, 0, 16], sizes = [1, 8, 8], strides = [1, 1, 1]} : vector<1x8x32xbf16> to vector<1x8x8xbf16>
    "tpu.trace_start"() <{level = 10 : i32, message = "bqd,bkd->bqk"}> : () -> ()
    %cst_29 = arith.constant dense<0.000000e+00> : vector<1x8x8xf32>
    %96 = tpu.matmul %93, %94, %cst_29 {dimension_numbers = #tpu.dot_dimension_numbers<[2], [2], [1], [1], [0, 0, 0, 1, 1, 1], [0], [0]>} : vector<1x8x8xbf16>, vector<1x8x8xbf16>, vector<1x8x8xf32> -> vector<1x8x8xf32>
    "tpu.trace_stop"() : () -> ()
    %cst_30 = arith.constant dense<0xFF800000> : vector<1x8xf32>
    %97 = vector.multi_reduction <maximumf>, %96, %cst_30 [2] : vector<1x8x8xf32> to vector<1x8xf32>
    %98 = vector.shape_cast %97 : vector<1x8xf32> to vector<1x8x1xf32>
    %99 = vector.broadcast %98 : vector<1x8x1xf32> to vector<1x8x8xf32>
    %100 = arith.subf %96, %99 : vector<1x8x8xf32>
    %101 = math.exp %100 : vector<1x8x8xf32>
    %cst_31 = arith.constant dense<0.000000e+00> : vector<1x8xf32>
    %102 = vector.multi_reduction <add>, %101, %cst_31 [2] : vector<1x8x8xf32> to vector<1x8xf32>
    %103 = vector.shape_cast %102 : vector<1x8xf32> to vector<1x8x1xf32>
    %104 = tpu.reciprocal %103 {approx = true} : vector<1x8x1xf32> -> vector<1x8x1xf32>
    %105 = vector.broadcast %104 : vector<1x8x1xf32> to vector<1x8x8xf32>
    %106 = arith.mulf %101, %105 : vector<1x8x8xf32>
    %107 = arith.truncf %106 : vector<1x8x8xf32> to vector<1x8x8xbf16>
    "tpu.trace_start"() <{level = 10 : i32, message = "bqk,bkd->bqd"}> : () -> ()
    %cst_32 = arith.constant dense<0.000000e+00> : vector<1x8x8xf32>
    %108 = tpu.matmul %107, %95, %cst_32 {dimension_numbers = #tpu.dot_dimension_numbers<[2], [1], [1], [2], [0, 0, 0, 1, 1, 2], [0], [0]>} : vector<1x8x8xbf16>, vector<1x8x8xbf16>, vector<1x8x8xf32> -> vector<1x8x8xf32>
    "tpu.trace_stop"() : () -> ()
    %109 = vector.shape_cast %108 : vector<1x8x8xf32> to vector<8x8xf32>
    %110 = arith.truncf %109 : vector<8x8xf32> to vector<8x8xbf16>
    %111 = vector.extract_strided_slice %49 {offsets = [16, 0], sizes = [8, 32], strides = [1, 1]} : vector<32x32xbf16> to vector<8x32xbf16>
    %cst_33 = arith.constant dense<0.000000e+00> : vector<8x32xf32>
    %112 = tpu.matmul %110, %111, %cst_33 {dimension_numbers = #tpu.dot_dimension_numbers<[1], [0], [0], [1], [0, 0, 1, 1], [], []>} : vector<8x8xbf16>, vector<8x32xbf16>, vector<8x32xf32> -> vector<8x32xf32>
    %113 = arith.addf %92, %112 : vector<8x32xf32>
    %114 = vector.extract_strided_slice %42 {offsets = [0, 0, 24], sizes = [1, 8, 8], strides = [1, 1, 1]} : vector<1x8x32xbf16> to vector<1x8x8xbf16>
    %115 = vector.extract_strided_slice %45 {offsets = [0, 0, 24], sizes = [1, 8, 8], strides = [1, 1, 1]} : vector<1x8x32xbf16> to vector<1x8x8xbf16>
    %116 = vector.extract_strided_slice %48 {offsets = [0, 0, 24], sizes = [1, 8, 8], strides = [1, 1, 1]} : vector<1x8x32xbf16> to vector<1x8x8xbf16>
    "tpu.trace_start"() <{level = 10 : i32, message = "bqd,bkd->bqk"}> : () -> ()
    %cst_34 = arith.constant dense<0.000000e+00> : vector<1x8x8xf32>
    %117 = tpu.matmul %114, %115, %cst_34 {dimension_numbers = #tpu.dot_dimension_numbers<[2], [2], [1], [1], [0, 0, 0, 1, 1, 1], [0], [0]>} : vector<1x8x8xbf16>, vector<1x8x8xbf16>, vector<1x8x8xf32> -> vector<1x8x8xf32>
    "tpu.trace_stop"() : () -> ()
    %cst_35 = arith.constant dense<0xFF800000> : vector<1x8xf32>
    %118 = vector.multi_reduction <maximumf>, %117, %cst_35 [2] : vector<1x8x8xf32> to vector<1x8xf32>
    %119 = vector.shape_cast %118 : vector<1x8xf32> to vector<1x8x1xf32>
    %120 = vector.broadcast %119 : vector<1x8x1xf32> to vector<1x8x8xf32>
    %121 = arith.subf %117, %120 : vector<1x8x8xf32>
    %122 = math.exp %121 : vector<1x8x8xf32>
    %cst_36 = arith.constant dense<0.000000e+00> : vector<1x8xf32>
    %123 = vector.multi_reduction <add>, %122, %cst_36 [2] : vector<1x8x8xf32> to vector<1x8xf32>
    %124 = vector.shape_cast %123 : vector<1x8xf32> to vector<1x8x1xf32>
    %125 = tpu.reciprocal %124 {approx = true} : vector<1x8x1xf32> -> vector<1x8x1xf32>
    %126 = vector.broadcast %125 : vector<1x8x1xf32> to vector<1x8x8xf32>
    %127 = arith.mulf %122, %126 : vector<1x8x8xf32>
    %128 = arith.truncf %127 : vector<1x8x8xf32> to vector<1x8x8xbf16>
    "tpu.trace_start"() <{level = 10 : i32, message = "bqk,bkd->bqd"}> : () -> ()
    %cst_37 = arith.constant dense<0.000000e+00> : vector<1x8x8xf32>
    %129 = tpu.matmul %128, %116, %cst_37 {dimension_numbers = #tpu.dot_dimension_numbers<[2], [1], [1], [2], [0, 0, 0, 1, 1, 2], [0], [0]>} : vector<1x8x8xbf16>, vector<1x8x8xbf16>, vector<1x8x8xf32> -> vector<1x8x8xf32>
    "tpu.trace_stop"() : () -> ()
    %130 = vector.shape_cast %129 : vector<1x8x8xf32> to vector<8x8xf32>
    %131 = arith.truncf %130 : vector<8x8xf32> to vector<8x8xbf16>
    %132 = vector.extract_strided_slice %49 {offsets = [24, 0], sizes = [8, 32], strides = [1, 1]} : vector<32x32xbf16> to vector<8x32xbf16>
    %cst_38 = arith.constant dense<0.000000e+00> : vector<8x32xf32>
    %133 = tpu.matmul %131, %132, %cst_38 {dimension_numbers = #tpu.dot_dimension_numbers<[1], [0], [0], [1], [0, 0, 1, 1], [], []>} : vector<8x8xbf16>, vector<8x32xbf16>, vector<8x32xf32> -> vector<8x32xf32>
    %134 = arith.addf %113, %133 : vector<8x32xf32>
    %c0_39 = arith.constant 0 : index
    %c0_40 = arith.constant 0 : index
    %135 = vector.load %arg7[%c0_39, %c0_40] : memref<1x32xf32, #tpu.memory_space<vmem>>, vector<1x32xf32>
    %136 = vector.shape_cast %135 : vector<1x32xf32> to vector<32xf32>
    %137 = vector.shape_cast %136 : vector<32xf32> to vector<1x32xf32>
    %138 = vector.broadcast %137 : vector<1x32xf32> to vector<8x32xf32>
    %139 = arith.addf %134, %138 : vector<8x32xf32>
    %c0_41 = arith.constant 0 : index
    %c0_42 = arith.constant 0 : index
    %140 = vector.load %arg14[%c0_41, %c0_42] : memref<1x32xf32, #tpu.memory_space<vmem>>, vector<1x32xf32>
    %141 = vector.shape_cast %140 : vector<1x32xf32> to vector<32xf32>
    %142 = vector.shape_cast %139 : vector<8x32xf32> to vector<1x8x32xf32>
    %143 = vector.shape_cast %141 : vector<32xf32> to vector<1x1x32xf32>
    %144 = vector.broadcast %143 : vector<1x1x32xf32> to vector<1x8x32xf32>
    %145 = arith.mulf %144, %142 : vector<1x8x32xf32>
    %146 = arith.addf %0, %145 : vector<1x8x32xf32>
    %c0_43 = arith.constant 0 : index
    %c0_44 = arith.constant 0 : index
    %147 = vector.load %arg8[%c0_43, %c0_44] : memref<1x32xf32, #tpu.memory_space<vmem>>, vector<1x32xf32>
    %148 = vector.shape_cast %147 : vector<1x32xf32> to vector<32xf32>
    %c0_45 = arith.constant 0 : index
    %c0_46 = arith.constant 0 : index
    %149 = vector.load %arg9[%c0_45, %c0_46] : memref<1x32xf32, #tpu.memory_space<vmem>>, vector<1x32xf32>
    %150 = vector.shape_cast %149 : vector<1x32xf32> to vector<32xf32>
    %cst_47 = arith.constant dense<0.000000e+00> : vector<1x8xf32>
    %151 = vector.multi_reduction <add>, %146, %cst_47 [2] : vector<1x8x32xf32> to vector<1x8xf32>
    %152 = vector.shape_cast %151 : vector<1x8xf32> to vector<1x8x1xf32>
    %cst_48 = arith.constant 3.200000e+01 : f32
    %153 = vector.broadcast %cst_48 : f32 to vector<1x8x1xf32>
    %154 = arith.divf %152, %153 : vector<1x8x1xf32>
    %155 = vector.broadcast %154 : vector<1x8x1xf32> to vector<1x8x32xf32>
    %156 = arith.subf %146, %155 : vector<1x8x32xf32>
    %157 = arith.mulf %156, %156 : vector<1x8x32xf32>
    %cst_49 = arith.constant dense<0.000000e+00> : vector<1x8xf32>
    %158 = vector.multi_reduction <add>, %157, %cst_49 [2] : vector<1x8x32xf32> to vector<1x8xf32>
    %159 = vector.shape_cast %158 : vector<1x8xf32> to vector<1x8x1xf32>
    %cst_50 = arith.constant 3.200000e+01 : f32
    %160 = vector.broadcast %cst_50 : f32 to vector<1x8x1xf32>
    %161 = arith.divf %159, %160 : vector<1x8x1xf32>
    %162 = vector.broadcast %154 : vector<1x8x1xf32> to vector<1x8x32xf32>
    %163 = arith.subf %146, %162 : vector<1x8x32xf32>
    %cst_51 = arith.constant 9.99999974E-6 : f32
    %164 = vector.broadcast %cst_51 : f32 to vector<1x8x1xf32>
    %165 = arith.addf %161, %164 : vector<1x8x1xf32>
    %166 = math.rsqrt %165 : vector<1x8x1xf32>
    %167 = vector.broadcast %166 : vector<1x8x1xf32> to vector<1x8x32xf32>
    %168 = arith.mulf %163, %167 : vector<1x8x32xf32>
    %169 = vector.shape_cast %148 : vector<32xf32> to vector<1x1x32xf32>
    %170 = vector.broadcast %169 : vector<1x1x32xf32> to vector<1x8x32xf32>
    %171 = arith.mulf %168, %170 : vector<1x8x32xf32>
    %172 = vector.shape_cast %150 : vector<32xf32> to vector<1x1x32xf32>
    %173 = vector.broadcast %172 : vector<1x1x32xf32> to vector<1x8x32xf32>
    %174 = arith.addf %171, %173 : vector<1x8x32xf32>
    %175 = vector.shape_cast %174 : vector<1x8x32xf32> to vector<8x32xf32>
    %176 = arith.truncf %175 : vector<8x32xf32> to vector<8x32xbf16>
    %c0_52 = arith.constant 0 : index
    %c0_53 = arith.constant 0 : index
    %177 = vector.load %arg10[%c0_52, %c0_53] : memref<32x128xbf16, #tpu.memory_space<vmem>>, vector<32x128xbf16>
    %cst_54 = arith.constant dense<0.000000e+00> : vector<8x128xf32>
    %178 = tpu.matmul %176, %177, %cst_54 {dimension_numbers = #tpu.dot_dimension_numbers<[1], [0], [0], [1], [0, 0, 1, 1], [], []>} : vector<8x32xbf16>, vector<32x128xbf16>, vector<8x128xf32> -> vector<8x128xf32>
    %c0_55 = arith.constant 0 : index
    %c0_56 = arith.constant 0 : index
    %179 = vector.load %arg11[%c0_55, %c0_56] : memref<1x128xf32, #tpu.memory_space<vmem>>, vector<1x128xf32>
    %180 = vector.shape_cast %179 : vector<1x128xf32> to vector<128xf32>
    %181 = vector.shape_cast %180 : vector<128xf32> to vector<1x128xf32>
    %182 = vector.broadcast %181 : vector<1x128xf32> to vector<8x128xf32>
    %183 = arith.addf %178, %182 : vector<8x128xf32>
    %cst_57 = arith.constant 5.000000e-01 : f32
    %184 = vector.broadcast %cst_57 : f32 to vector<8x128xf32>
    %185 = arith.mulf %184, %183 : vector<8x128xf32>
    %cst_58 = arith.constant 0.707106769 : f32
    %186 = vector.broadcast %cst_58 : f32 to vector<8x128xf32>
    %187 = arith.mulf %183, %186 : vector<8x128xf32>
    %188 = math.erf %187 : vector<8x128xf32>
    %cst_59 = arith.constant 1.000000e+00 : f32
    %189 = vector.broadcast %cst_59 : f32 to vector<8x128xf32>
    %190 = arith.addf %189, %188 : vector<8x128xf32>
    %191 = arith.mulf %185, %190 : vector<8x128xf32>
    %192 = arith.truncf %191 : vector<8x128xf32> to vector<8x128xbf16>
    %c0_60 = arith.constant 0 : index
    %c0_61 = arith.constant 0 : index
    %193 = vector.load %arg12[%c0_60, %c0_61] : memref<128x32xbf16, #tpu.memory_space<vmem>>, vector<128x32xbf16>
    %cst_62 = arith.constant dense<0.000000e+00> : vector<8x32xf32>
    %194 = tpu.matmul %192, %193, %cst_62 {dimension_numbers = #tpu.dot_dimension_numbers<[1], [0], [0], [1], [0, 0, 1, 1], [], []>} : vector<8x128xbf16>, vector<128x32xbf16>, vector<8x32xf32> -> vector<8x32xf32>
    %c0_63 = arith.constant 0 : index
    %c0_64 = arith.constant 0 : index
    %195 = vector.load %arg13[%c0_63, %c0_64] : memref<1x32xf32, #tpu.memory_space<vmem>>, vector<1x32xf32>
    %196 = vector.shape_cast %195 : vector<1x32xf32> to vector<32xf32>
    %197 = vector.shape_cast %196 : vector<32xf32> to vector<1x32xf32>
    %198 = vector.broadcast %197 : vector<1x32xf32> to vector<8x32xf32>
    %199 = arith.addf %194, %198 : vector<8x32xf32>
    %c0_65 = arith.constant 0 : index
    %c0_66 = arith.constant 0 : index
    %200 = vector.load %arg15[%c0_65, %c0_66] : memref<1x32xf32, #tpu.memory_space<vmem>>, vector<1x32xf32>
    %201 = vector.shape_cast %200 : vector<1x32xf32> to vector<32xf32>
    %202 = vector.shape_cast %199 : vector<8x32xf32> to vector<1x8x32xf32>
    %203 = vector.shape_cast %201 : vector<32xf32> to vector<1x1x32xf32>
    %204 = vector.broadcast %203 : vector<1x1x32xf32> to vector<1x8x32xf32>
    %205 = arith.mulf %204, %202 : vector<1x8x32xf32>
    %206 = arith.addf %146, %205 : vector<1x8x32xf32>
    %c0_67 = arith.constant 0 : index
    %c0_68 = arith.constant 0 : index
    %c0_69 = arith.constant 0 : index
    %207 = vector.load %arg16[%c0_67, %c0_68, %c0_69] : memref<1x8x32xf32, #tpu.memory_space<vmem>>, vector<1x8x32xf32>
    tpu.vector_store %arg16[%c0_67, %c0_68, %c0_69], %206 {strides = array<i32>} : memref<1x8x32xf32, #tpu.memory_space<vmem>>, vector<1x8x32xf32>,
    return
  }
  func.func @transform_0(%arg0: i32) -> (i32, i32, i32) {
    %c0_i32 = arith.constant 0 : i32
    %c0_i32_0 = arith.constant 0 : i32
    %c0_i32_1 = arith.constant 0 : i32
    return %arg0, %c0_i32, %c0_i32_0 : i32, i32, i32
  }
  func.func @transform_1(%arg0: i32) -> (i32, i32) {
    %c0_i32 = arith.constant 0 : i32
    %c0_i32_0 = arith.constant 0 : i32
    %c0_i32_1 = arith.constant 0 : i32
    return %c0_i32, %c0_i32_0 : i32, i32
  }
  func.func @transform_2(%arg0: i32) -> (i32, i32) {
    %c0_i32 = arith.constant 0 : i32
    %c0_i32_0 = arith.constant 0 : i32
    %c0_i32_1 = arith.constant 0 : i32
    return %c0_i32, %c0_i32_0 : i32, i32
  }
  func.func @transform_3(%arg0: i32) -> (i32, i32) {
    %c0_i32 = arith.constant 0 : i32
    %c0_i32_0 = arith.constant 0 : i32
    %c0_i32_1 = arith.constant 0 : i32
    return %c0_i32, %c0_i32_0 : i32, i32
  }
  func.func @transform_4(%arg0: i32) -> (i32, i32) {
    %c0_i32 = arith.constant 0 : i32
    %c0_i32_0 = arith.constant 0 : i32
    %c0_i32_1 = arith.constant 0 : i32
    return %c0_i32, %c0_i32_0 : i32, i32
  }
  func.func @transform_5(%arg0: i32) -> (i32, i32) {
    %c0_i32 = arith.constant 0 : i32
    %c0_i32_0 = arith.constant 0 : i32
    %c0_i32_1 = arith.constant 0 : i32
    return %c0_i32, %c0_i32_0 : i32, i32
  }
  func.func @transform_6(%arg0: i32) -> (i32, i32) {
    %c0_i32 = arith.constant 0 : i32
    %c0_i32_0 = arith.constant 0 : i32
    %c0_i32_1 = arith.constant 0 : i32
    return %c0_i32, %c0_i32_0 : i32, i32
  }
  func.func @transform_7(%arg0: i32) -> (i32, i32) {
    %c0_i32 = arith.constant 0 : i32
    %c0_i32_0 = arith.constant 0 : i32
    %c0_i32_1 = arith.constant 0 : i32
    return %c0_i32, %c0_i32_0 : i32, i32
  }
  func.func @transform_8(%arg0: i32) -> (i32, i32) {
    %c0_i32 = arith.constant 0 : i32
    %c0_i32_0 = arith.constant 0 : i32
    %c0_i32_1 = arith.constant 0 : i32
    return %c0_i32, %c0_i32_0 : i32, i32
  }
  func.func @transform_9(%arg0: i32) -> (i32, i32) {
    %c0_i32 = arith.constant 0 : i32
    %c0_i32_0 = arith.constant 0 : i32
    %c0_i32_1 = arith.constant 0 : i32
    return %c0_i32, %c0_i32_0 : i32, i32
  }
  func.func @transform_10(%arg0: i32) -> (i32, i32) {
    %c0_i32 = arith.constant 0 : i32
    %c0_i32_0 = arith.constant 0 : i32
    %c0_i32_1 = arith.constant 0 : i32
    return %c0_i32, %c0_i32_0 : i32, i32
  }
  func.func @transform_11(%arg0: i32) -> (i32, i32) {
    %c0_i32 = arith.constant 0 : i32
    %c0_i32_0 = arith.constant 0 : i32
    %c0_i32_1 = arith.constant 0 : i32
    return %c0_i32, %c0_i32_0 : i32, i32
  }
  func.func @transform_12(%arg0: i32) -> (i32, i32) {
    %c0_i32 = arith.constant 0 : i32
    %c0_i32_0 = arith.constant 0 : i32
    %c0_i32_1 = arith.constant 0 : i32
    return %c0_i32, %c0_i32_0 : i32, i32
  }
  func.func @transform_13(%arg0: i32) -> (i32, i32) {
    %c0_i32 = arith.constant 0 : i32
    %c0_i32_0 = arith.constant 0 : i32
    %c0_i32_1 = arith.constant 0 : i32
    return %c0_i32, %c0_i32_0 : i32, i32
  }
  func.func @transform_14(%arg0: i32) -> (i32, i32) {
    %c0_i32 = arith.constant 0 : i32
    %c0_i32_0 = arith.constant 0 : i32
    %c0_i32_1 = arith.constant 0 : i32
    return %c0_i32, %c0_i32_0 : i32, i32
  }
  func.func @transform_15(%arg0: i32) -> (i32, i32, i32) {
    %c0_i32 = arith.constant 0 : i32
    %c0_i32_0 = arith.constant 0 : i32
    %c0_i32_1 = arith.constant 0 : i32
    return %arg0, %c0_i32, %c0_i32_0 : i32, i32, i32
  }
}

</mosaic_0001>

<bundles_post_ra>
// kernel: tpu_custom_call.1
= control target key start
LH: loop header
LB: loop body
LE: loop exit
PB: predicated region body
PF: predicated region fallthrough
CT: control target
= control target key end

     0   :  { %s2279_s0 = inlined_call_operand.vmem [shape: f32[2,8,32], index: 0, kind: input, shape index: {}]   ;;  %s2280_s1 = inlined_call_operand.vmem [shape: f32[1,32], index: 1, kind: input, shape index: {}]   ;;  %s2281_s2 = inlined_call_operand.vmem [shape: f32[1,32], index: 2, kind: input, shape index: {}]   ;;  %s2282_s3 = inlined_call_operand.vmem [shape: bf16[32,96], index: 3, kind: input, shape index: {}]   ;;  %s2283_s4 = inlined_call_operand.vmem [shape: f32[1,96], index: 4, kind: input, shape index: {}]   ;;  %s2284_s5 = inlined_call_operand.vmem [shape: bf16[32,32], index: 5, kind: input, shape index: {}]   ;;  %s2285_s6 = inlined_call_operand.vmem [shape: f32[1,32], index: 6, kind: input, shape index: {}]   ;;  %s2286_s7 = inlined_call_operand.vmem [shape: f32[1,32], index: 7, kind: input, shape index: {}]   ;;  %s2287_s8 = inlined_call_operand.vmem [shape: f32[1,32], index: 8, kind: input, shape index: {}]   ;;  %s2288_s9 = inlined_call_operand.vmem [shape: bf16[32,128], index: 9, kind: input, shape index: {}]   ;;  %s2289_s10 = inlined_call_operand.vmem [shape: f32[1,128], index: 10, kind: input, shape index: {}]   ;;  %s2290_s11 = inlined_call_operand.vmem [shape: bf16[128,32], index: 11, kind: input, shape index: {}]   ;;  %s2291_s12 = inlined_call_operand.vmem [shape: f32[1,32], index: 12, kind: input, shape index: {}]   ;;  %s2292_s13 = inlined_call_operand.vmem [shape: f32[1,32], index: 13, kind: input, shape index: {}]   ;;  %s2293_s14 = inlined_call_operand.vmem [shape: f32[1,32], index: 14, kind: input, shape index: {}]   ;;  %s2294_s15 = inlined_call_operand.hbm [shape: f32[2,8,32], index: 15, kind: output, shape index: {}]  }
   0x1   :  { %2295 = sst [smem:[#allocation5_spill]] %s2279_s0 }
   0x2   :  { %2296 = sst [smem:[#allocation6_spill]] %s2280_s1 }
   0x3   :  { %2297 = sst [smem:[#allocation7_spill]] %s2281_s2 }
   0x4   :  { %2298 = sst [smem:[#allocation8_spill]] %s2282_s3 }
   0x5   :  { %2299 = sst [smem:[#allocation9_spill]] %s2283_s4 }
   0x6   :  { %20 = vsyncpa [#allocation3], 0 }
   0x7   :  { %22 = vsyncpa [#allocation3 + $0x1], 0  ;;  %s1979_s18 = smov 0   ;;  %s1981_s19 = smov 0  }
   0x8   :  { %s1983_s20 = smov 0   ;;  %s1985_s21 = smov 0  }
   0x9 LB: > { %s2000_s22 = sadd.s32 4294967295, %s1883_s21   ;;  %s1542_s23 = sadd.s32 4294967294, %s1883_s21   ;;  %s1883_s21 = sphi %s1985_s21, %s2310_s21   ;;  %s1879_s20 = sphi %s1983_s20, %s2309_s20   ;;  %s1875_s19 = sphi %s1981_s19, %s2308_s19   ;;  %s1871_s18 = sphi %s1979_s18, %s2307_s18  }
   0xa   : > { %s2004_s24 = sadd.s32 1, %s1883_s21   ;;  %s355_s25 = sadd.s32 1, %s1879_s20 }
   0xb   : > { %s352_s26 = ssub.s32 %s1883_s21, %s2004_s24  ;;  %p365_p0 = scmp.ne.s32.totalorder %s1879_s20, %s1875_s19 }
   0xc   : > { %p353_p1 = scmp.eq.s32.totalorder %s352_s26, 0  ;;  %p366_p2 = scmp.eq.s32.totalorder %s2000_s22, 1 }
   0xd   : > { %p371_p3 = scmp.ne.s32.totalorder %s1875_s19, %s1871_s18  ;;  %p372_p4 = scmp.eq.s32.totalorder %s1542_s23, 1 }
   0xe   : > { %s2015_s27 = scalar_select %p353_p1, %s1879_s20, %s355_s25  }
   0xf   : > { %p2017_p5 = por %p366_p2, %p365_p0  ;;  %p2021_p6 = por %p372_p4, %p371_p3 }
  0x10   : > { %p1545_p7 = scmp.ge.s32.totalorder %s1883_s21, 1  ;;  %p439_p8 = scmp.lt.s32.totalorder %s1883_s21, 3 }
  0x12   : > { %p440_p9 = pnand %p1545_p7, %p439_p8 }
  0x13   : > { %p486_p10 = scmp.lt.s32.totalorder (!%p440_p9), %s2000_s22, 1  ;;  %vm494_vm0 = vcmask (!%p440_p9), 261120   ;;  %s2302_s0 = sld [smem:[#allocation5_spill]] (!%p440_p9)  ;;  %v1885_v8 = vmov (!%p440_p9), 0.0   ;;  %vm1886_vm1 = vmmov (!%p440_p9), 0   ;;  %vm600_vm2 = vcmask (!%p440_p9), 64512  }
  0x14   : > { %443 = sbr.rel (%p440_p9) target bundleno = 4250 (0x109a), region = 80  ;;  %s2303_s3 = sld [smem:[#allocation8_spill]] (!%p440_p9)  ;;  %1627 = vmatprep.subr.bf16.mxu1 (!%p440_p9), %v1885_v8  ;;  %1631 = vmatprep.mubr.msk.bf16.mxu1 (!%p440_p9), %vm1886_vm1, %v1885_v8  ;;  %vm664_vm3 = vcmask (!%p440_p9), 1043456  }
  0x15   : > { %1653 = vmatprep.subr.bf16.mxu0 (!%p440_p9), %v1885_v8  ;;  %1655 = vmatprep.mubr.msk.bf16.mxu0 (!%p440_p9), %vm1886_vm1, %v1885_v8  ;;  %s2304_s1 = sld [smem:[#allocation6_spill]] (!%p440_p9)  ;;  %s2305_s2 = sld [smem:[#allocation7_spill]] (!%p440_p9) }
  0x16   : > { %s2306_s4 = sld [smem:[#allocation9_spill]] (!%p440_p9)  ;;  %s1887_s23 = smov (!%p440_p9), 64  }
  0x17   : > { %s1889_s26 = smov (!%p440_p9), 88   ;;  %s1892_s17 = smov (!%p440_p9), 80  }
  0x1a   : > { %v1787_v7 = vld [vmem:[%s2303_s3] sm:$0xff] (!%p440_p9)   ;;  %v1788_v9 = vld [vmem:[%s2303_s3 + $0x8] sm:$0xff] (!%p440_p9)  }
  0x1b   : > { %s487_s30 = scalar_select %p486_p10, %s2000_s22, 1  ;;  %1628 = vmatpush3.bf16.msra.mxu1 %v1787_v7  ;;  %v1548_v14 = vld [vmem:[%s2304_s1] ss:$0 sm:$0xff] }
  0x1c   : > { %1629 = vmatprep.subr.bf16.mxu1 %v1885_v8  ;;  %v1549_v16 = vld [vmem:[%s2305_s2] ss:$0 sm:$0xff] }
  0x1d   : > { %s1547_s16 = sshll.u32 %s487_s30, 3  ;;  %v1550_v20 = vld [vmem:[%s2306_s4] ss:$0 sm:$0xff]  ;;  %s1890_s30 = smov 120  }
  0x1e   : > { %s489_s25 = scalar_lea.vmem %s2302_s0, %s1547_s16  ;;  %s1891_s16 = smov 56   ;;  %v593_v7 = vld [vmem:[%s2284_s5] sm:$0xf] }
  0x1f   : > { %v2032_v0 = vld [vmem:[%s489_s25] sm:$0xff]  ;;  %1630 = vmatpush3.bf16.msra.mxu1 %v1788_v9  ;;  %s1888_s25 = smov 96  }
  0x20   : > { %v495_v1 = vsel %vm494_vm0, %v2032_v0, 0.0  ;;  %1635 = vmatprep.subr.bf16.mxu1 %v1885_v8 }
  0x21   : > { %496 = vadd.xlane.f32.xlu0 %v495_v1 }
  0xae   : > { %v497_v2 = vpop.xlane.xlu0 %496 }
  0xaf   : > { %v499_v3 = vmul.f32 0.03125, %v497_v2 }
  0xb1   : > { %v500_v4 = vsub.f32 %v2032_v0, %v499_v3  ;;  %v594_v3 = vld [vmem:[%s2284_s5 + $0x4] sm:$0xf] }
  0xb3   : > { %v501_v5 = vmul.f32 %v500_v4, %v500_v4 }
  0xb5   : > { %v502_v6 = vsel %vm494_vm0, %v501_v5, 0.0 }
  0xb6   : > { %503 = vadd.xlane.f32.xlu0 %v502_v6 }
 0x143   : > { %v504_v10 = vpop.xlane.xlu0 %503 }
 0x144   : > { %v505_v11 = vmul.f32 0.03125, %v504_v10 }
 0x146   : > { %v506_v12 = vadd.f32 1e-05, %v505_v11  ;;  %v871_v11 = vsel %vm664_vm3, %v593_v7, 0 }
 0x148   : > { %1799 = vrsqrt.f32 %v506_v12 }
 0x152   : > { %v1800_v13 = vpop.eup %1799 }
 0x153   : > { %v508_v15 = vmul.f32 %v1800_v13, %v500_v4  ;;  %v825_v4 = vsel %vm664_vm3, %v594_v3, 0 }
 0x155   : > { %v515_v17 = vmul.f32 %v1548_v14, %v508_v15 }
 0x157   : > { %v522_v18 = vadd.f32 %v1549_v16, %v515_v17 }
 0x159   : > { %v523_v19 = vpack.c.bf16 %v522_v18, %v522_v18 }
 0x15b   : > { %1632 = vmatmul.mubr.msk.bf16.vlgmr.msra.gmra.mrb[0].mxu1 %vm494_vm0, %v523_v19 }
 0x15c   : > { %1637 = vmatprep.mubr.msk.bf16.mxu1 %vm1886_vm1, %v1885_v8 }
 0x22e   : > { %v584_v21 = vpop.f32.mrb[0].mxu1 }
 0x22f   : > { %v585_v22 = vadd.f32 %v1550_v20, %v584_v21  ;;  %v1633_v23 = vpop.f32.mrb[1].mxu1 }
 0x230   : > { %v587_v24 = vpop.f32.mrb[2].mxu1 }
 0x231   : > { %v2064_v25 = vpack.c.bf16 %v585_v22, %v585_v22  ;;  %v1634_v26 = vpop.f32.mrb[3].mxu1  ;;  %v590_v29 = vmul.f32 0.35355338, %v585_v22 }
 0x233   : > { %659 = vrot.lane.b32.xlu0 %v2064_v25, %s1887_s23  ;;  %598 = vrot.lane.b32.xlu1 %v2064_v25, %s1888_s25  ;;  %v2070_v31 = vpack.c.bf16 %v590_v29, %v590_v29  ;;  %s1893_s23 = smov 112   ;;  %s1894_s25 = smov 48  }
 0x2a5   : > { %v599_v27 = vpop.permute.xlu1 %598  ;;  %v660_v30 = vpop.permute.xlu0 %659 }
 0x2a6   : > { %v605_v28 = vsel %vm600_vm2, %v599_v27, 0  ;;  %v666_v32 = vsel %vm664_vm3, %v660_v30, 0 }
 0x2a7   : > { %1636 = vmatpush3.bf16.xpose.msra.mxu1 %v605_v28 }
 0x2a8   : > { %1641 = vmatprep.subr.bf16.mxu1 %v1885_v8 }
 0x2ae   : > { %1638 = vmatmul.mubr.msk.bf16.vlgmr.msra.gmra.mrb[4].mxu1 %vm600_vm2, %v2070_v31 }
 0x2af   : > { %1642 = vmatpush3.bf16.msra.mxu1 %v666_v32  ;;  %1643 = vmatprep.mubr.msk.bf16.mxu1 %vm1886_vm1, %v1885_v8 }
 0x2b0   : > { %1647 = vmatprep.subr.bf16.mxu1 %v1885_v8 }
 0x381   : > { %v641_v33 = vpop.f32.mrb[4].mxu1 }
 0x382   : > { %v1639_v34 = vpop.f32.mrb[5].mxu1  ;;  %v647_v35 = vsel %vm600_vm2, %v641_v33, -inf }
 0x383   : > { %648 = vmax.xlane.f32.xlu1 %v647_v35  ;;  %v644_v36 = vpop.f32.mrb[6].mxu1 }
 0x384   : > { %v1640_v37 = vpop.f32.mrb[7].mxu1 }
 0x410   : > { %v649_v38 = vpop.xlane.xlu1 %648 }
 0x411   : > { %v650_v39 = vsub.f32 %v641_v33, %v649_v38 }
 0x413   : > { %v651_v40 = vmul.f32 1.442695, %v650_v39 }
 0x415   : > { %1801 = vpow2.f32 %v651_v40 }
 0x41f   : > { %v1802_v41 = vpop.eup %1801 }
 0x420   : > { %v653_v42 = vsel %vm600_vm2, %v1802_v41, 0.0 }
 0x421   : > { %654 = vadd.xlane.f32.xlu0 %v653_v42 }
 0x437   : > { %712 = vrot.lane.b32.xlu0 %v2064_v25, %s1889_s26 }
 0x43b   : > { %710 = vrot.lane.b32.xlu0 %v2070_v31, %s1890_s30 }
 0x4ae   : > { %v655_v43 = vpop.xlane.xlu0 %654 }
 0x4af   : > { %1803 = vrcp.f32 %v655_v43 }
 0x4b2   : > { %v713_v46 = vpop.permute.xlu0 %712 }
 0x4b3   : > { %v718_v48 = vsel %vm600_vm2, %v713_v46, 0 }
 0x4b6   : > { %v711_v49 = vpop.permute.xlu0 %710 }
 0x4b9   : > { %v1804_v44 = vpop.eup %1803 }
 0x4ba   : > { %v657_v45 = vmul.f32 %v1804_v44, %v1802_v41 }
 0x4bc   : > { %v658_v47 = vpack.c.bf16 %v657_v45, %v657_v45 }
 0x4be   : > { %1644 = vmatmul.mubr.msk.bf16.vlgmr.msra.gmra.mrb[8].mxu1 %vm600_vm2, %v658_v47 }
 0x4bf   : > { %1648 = vmatpush3.bf16.xpose.msra.mxu1 %v718_v48  ;;  %1649 = vmatprep.mubr.msk.bf16.mxu1 %vm1886_vm1, %v1885_v8 }
 0x4c0   : > { %1659 = vmatprep.subr.bf16.mxu1 %v1885_v8 }
 0x4c6   : > { %1650 = vmatmul.mubr.msk.bf16.vlgmr.msra.gmra.mrb[12].mxu1 %vm600_vm2, %v711_v49 }
 0x4c7   : > { %1661 = vmatprep.mubr.msk.bf16.mxu1 %vm1886_vm1, %v1885_v8  ;;  %1660 = vmatpush3.bf16.msra.mxu1 %v825_v4 }
 0x4c8   : > { %1671 = vmatprep.subr.bf16.mxu1 %v1885_v8 }
 0x591   : > { %v702_v50 = vpop.f32.mrb[8].mxu1 }
 0x592   : > { %v1645_v51 = vpop.f32.mrb[9].mxu1  ;;  %v708_v13 = vpack.c.bf16 %v702_v50, %v702_v50 }
 0x593   : > { %v705_v52 = vpop.f32.mrb[10].mxu1 }
 0x594   : > { %v1646_v53 = vpop.f32.mrb[11].mxu1 }
 0x599   : > { %v754_v54 = vpop.f32.mrb[12].mxu1 }
 0x59a   : > { %v1651_v55 = vpop.f32.mrb[13].mxu1  ;;  %v760_v56 = vsel %vm600_vm2, %v754_v54, -inf }
 0x59b   : > { %761 = vmax.xlane.f32.xlu1 %v760_v56  ;;  %v757_v57 = vpop.f32.mrb[14].mxu1 }
 0x59c   : > { %v1652_v58 = vpop.f32.mrb[15].mxu1 }
 0x5ac   : > { %772 = vrot.lane.b32.xlu1 %v2064_v25, %s1891_s16  ;;  %s1897_s16 = smov 40  }
 0x5b0   : > { %915 = vrot.lane.b32.xlu1 %v2064_v25, %s1892_s17  ;;  %s1585_s17 = sshll.u32 %s2000_s22, 7 }
 0x5b1   : > { %s2236_s1 = scalar_lea.hbm %s2294_s15, %s1585_s17 }
 0x5b4   : > { %913 = vrot.lane.b32.xlu1 %v2070_v31, %s1893_s23  ;;  %s1895_s23 = smov 72  }
 0x628   : > { %v762_v59 = vpop.xlane.xlu1 %761 }
 0x629   : > { %v763_v60 = vsub.f32 %v754_v54, %v762_v59 }
 0x62b   : > { %v764_v61 = vmul.f32 1.442695, %v763_v60 }
 0x62c   : > { %v773_v62 = vpop.permute.xlu1 %772 }
 0x62d   : > { %1805 = vpow2.f32 %v764_v61  ;;  %v778_v63 = vsel %vm664_vm3, %v773_v62, 0 }
 0x62e   : > { %1654 = vmatpush3.bf16.msra.mxu0 %v778_v63 }
 0x62f   : > { %1665 = vmatprep.subr.bf16.mxu0 %v1885_v8 }
 0x630   : > { %v916_v15 = vpop.permute.xlu1 %915 }
 0x631   : > { %v921_v20 = vsel %vm600_vm2, %v916_v15, 0 }
 0x634   : > { %v914_v24 = vpop.permute.xlu1 %913 }
 0x637   : > { %v1806_v1 = vpop.eup %1805 }
 0x638   : > { %v766_v2 = vsel %vm600_vm2, %v1806_v1, 0.0 }
 0x639   : > { %767 = vadd.xlane.f32.xlu0 %v766_v2 }
 0x64f   : > { %975 = vrot.lane.b32.xlu0 %v2064_v25, %s1894_s25  ;;  %s1896_s25 = smov 104  }
 0x6c6   : > { %v768_v5 = vpop.xlane.xlu0 %767 }
 0x6c7   : > { %1807 = vrcp.f32 %v768_v5 }
 0x6ca   : > { %v976_v12 = vpop.permute.xlu0 %975 }
 0x6cb   : > { %v981_v14 = vsel %vm664_vm3, %v976_v12, 0 }
 0x6d1   : > { %v1808_v6 = vpop.eup %1807 }
 0x6d2   : > { %v770_v9 = vmul.f32 %v1808_v6, %v1806_v1  ;;  %v596_v6 = vld [vmem:[%s2284_s5 + $0xc] sm:$0xf] }
 0x6d4   : > { %v771_v10 = vpack.c.bf16 %v770_v9, %v770_v9 }
 0x6d6   : > { %1656 = vmatmul.mubr.msk.bf16.vlgmr.msra.gmra.mrb[0].mxu0 %vm600_vm2, %v771_v10 }
 0x6d7   : > { %1666 = vmatpush3.bf16.msra.mxu0 %v871_v11  ;;  %1667 = vmatprep.mubr.msk.bf16.mxu0 %vm1886_vm1, %v1885_v8 }
 0x6d8   : > { %1677 = vmatprep.subr.bf16.mxu0 %v1885_v8 }
 0x6de   : > { %1668 = vmatmul.mubr.msk.bf16.vlgmr.msra.gmra.mrb[4].mxu0 %vm600_vm2, %v708_v13 }
 0x6df   : > { %1678 = vmatpush3.bf16.msra.mxu0 %v981_v14  ;;  %1679 = vmatprep.mubr.msk.bf16.mxu0 %vm1886_vm1, %v1885_v8 }
 0x6e0   : > { %1689 = vmatprep.subr.bf16.mxu0 %v1885_v8 }
 0x7a9   : > { %v814_v16 = vpop.f32.mrb[0].mxu0 }
 0x7aa   : > { %v820_v17 = vpack.c.bf16 %v814_v16, %v814_v16  ;;  %v1657_v18 = vpop.f32.mrb[1].mxu0 }
 0x7ab   : > { %v817_v19 = vpop.f32.mrb[2].mxu0 }
 0x7ac   : > { %v1658_v21 = vpop.f32.mrb[3].mxu0  ;;  %1662 = vmatmul.mubr.msk.bf16.vlgmr.msra.gmra.mrb[16].mxu1 %vm600_vm2, %v820_v17 }
 0x7ad   : > { %1672 = vmatpush3.bf16.xpose.msra.mxu1 %v921_v20  ;;  %1673 = vmatprep.mubr.msk.bf16.mxu1 %vm1886_vm1, %v1885_v8 }
 0x7ae   : > { %1683 = vmatprep.subr.bf16.mxu1 %v1885_v8 }
 0x7b1   : > { %v907_v22 = vpop.f32.mrb[4].mxu0 }
 0x7b2   : > { %v1669_v23 = vpop.f32.mrb[5].mxu0 }
 0x7b3   : > { %v910_v26 = vpop.f32.mrb[6].mxu0  ;;  %v1566_v23 = vld [vmem:[%s2285_s6] ss:$0 sm:$0xff] }
 0x7b4   : > { %v1670_v27 = vpop.f32.mrb[7].mxu0  ;;  %1674 = vmatmul.mubr.msk.bf16.vlgmr.msra.gmra.mrb[20].mxu1 %vm600_vm2, %v914_v24 }
 0x7b5   : > { %1685 = vmatprep.mubr.msk.bf16.mxu1 %vm1886_vm1, %v1885_v8  ;;  %v1567_v27 = vld [vmem:[%s2292_s13] ss:$0 sm:$0xff] }
 0x87f   : > { %v861_v28 = vpop.f32.mrb[16].mxu1 }
 0x880   : > { %v2124_v29 = vadd.f32 %v907_v22, %v861_v28  ;;  %v1663_v30 = vpop.f32.mrb[17].mxu1 }
 0x881   : > { %v864_v32 = vpop.f32.mrb[18].mxu1 }
 0x882   : > { %v1664_v33 = vpop.f32.mrb[19].mxu1 }
 0x887   : > { %v957_v34 = vpop.f32.mrb[20].mxu1 }
 0x888   : > { %v1675_v35 = vpop.f32.mrb[21].mxu1  ;;  %v963_v36 = vsel %vm600_vm2, %v957_v34, -inf }
 0x889   : > { %964 = vmax.xlane.f32.xlu1 %v963_v36  ;;  %v960_v37 = vpop.f32.mrb[22].mxu1 }
 0x88a   : > { %v1676_v38 = vpop.f32.mrb[23].mxu1 }
 0x916   : > { %v965_v39 = vpop.xlane.xlu1 %964 }
 0x917   : > { %v966_v40 = vsub.f32 %v957_v34, %v965_v39 }
 0x919   : > { %v967_v41 = vmul.f32 1.442695, %v966_v40  ;;  %v1789_v40 = vld [vmem:[%s2288_s9] sm:$0xff]  }
 0x91b   : > { %1809 = vpow2.f32 %v967_v41  ;;  %v1791_v41 = vld [vmem:[%s2290_s11] sm:$0xff]  }
 0x925   : > { %v1810_v42 = vpop.eup %1809 }
 0x926   : > { %v969_v43 = vsel %vm600_vm2, %v1810_v42, 0.0 }
 0x927   : > { %970 = vadd.xlane.f32.xlu0 %v969_v43  ;;  %v1793_v43 = vld [vmem:[%s2290_s11 + $0x10] sm:$0xff]  }
 0x93d   : > { %1073 = vrot.lane.b32.xlu0 %v2064_v25, %s1895_s23 }
 0x941   : > { %1071 = vrot.lane.b32.xlu0 %v2070_v31, %s1896_s25  ;;  %v595_v31 = vld [vmem:[%s2284_s5 + $0x8] sm:$0xf]  ;;  %s483_s25 = sand.u32 1, %s1875_s19  }
 0x942   : > { %v1028_v51 = vsel %vm664_vm3, %v595_v31, 0  ;;  %s1546_s0 = sshll.u32 %s483_s25, 3  ;;  %s1470_s26 = scalar_lea.sflag [#allocation3], %s483_s25 }
 0x943   : > { %1684 = vmatpush3.bf16.msra.mxu1 %v1028_v51  ;;  %s485_s23 = scalar_lea.vmem [#allocation2], %s1546_s0  ;;  %s1898_s0 = smov [#allocation2]  }
 0x944   : > { %1695 = vmatprep.subr.bf16.mxu1 %v1885_v8  ;;  %s1483_s2 = sshll.u32 %s485_s23, 4  ;;  %s1825_s30 = sshll.u32 %s1898_s0, 4  ;;  %s2238_s2 = int_to_ptr.vmem [resolvable:$true] %s1483_s2  ;;  %s1826_s30 = int_to_ptr.vmem [resolvable:$false] %s1825_s30 }
 0x945   : > { %s1821_s22 = scalar_lea.vmem %s2238_s2, 128  ;;  %p1828_p0 = scmp.lt.s32.totalorder %s2238_s2, %s1826_s30 }
 0x946   : > { %p1822_p11 = scmp.ne.s32.totalorder %s2238_s2, %s1821_s22 }
 0x948   : > { %p1823_p12 = pnand %p1822_p11, %p2017_p5 }
 0x94a   : > { %p1824_p13 = pneg %p1823_p12 }
 0x9b4   : > { %v971_v44 = vpop.xlane.xlu0 %970 }
 0x9b5   : > { %1811 = vrcp.f32 %v971_v44 }
 0x9b8   : > { %v1074_v47 = vpop.permute.xlu0 %1073 }
 0x9b9   : > { %v1079_v49 = vsel %vm600_vm2, %v1074_v47, 0 }
 0x9bc   : > { %v1072_v50 = vpop.permute.xlu0 %1071 }
 0x9bf   : > { %v1812_v45 = vpop.eup %1811 }
 0x9c0   : > { %v973_v46 = vmul.f32 %v1812_v45, %v1810_v42  ;;  %v1792_v42 = vld [vmem:[%s2290_s11 + $0x8] sm:$0xff]  }
 0x9c2   : > { %v974_v48 = vpack.c.bf16 %v973_v46, %v973_v46 }
 0x9c4   : > { %1680 = vmatmul.mubr.msk.bf16.vlgmr.msra.gmra.mrb[8].mxu0 %vm600_vm2, %v974_v48  ;;  %v1568_v48 = vld [vmem:[%s2286_s7] ss:$0 sm:$0xff] }
 0x9c5   : > { %1690 = vmatpush3.bf16.xpose.msra.mxu0 %v1079_v49  ;;  %1691 = vmatprep.mubr.msk.bf16.mxu0 %vm1886_vm1, %v1885_v8 }
 0x9c6   : > { %1701 = vmatprep.subr.bf16.mxu0 %v1885_v8 }
 0x9cc   : > { %1692 = vmatmul.mubr.msk.bf16.vlgmr.msra.gmra.mrb[12].mxu0 %vm600_vm2, %v1072_v50  ;;  %v1569_v50 = vld [vmem:[%s2287_s8] ss:$0 sm:$0xff] }
 0x9cd   : > { %1703 = vmatprep.mubr.msk.bf16.mxu0 %vm1886_vm1, %v1885_v8 }
 0xa97   : > { %v1017_v52 = vpop.f32.mrb[8].mxu0 }
 0xa98   : > { %v1023_v53 = vpack.c.bf16 %v1017_v52, %v1017_v52  ;;  %v1681_v54 = vpop.f32.mrb[9].mxu0 }
 0xa99   : > { %v1020_v55 = vpop.f32.mrb[10].mxu0  ;;  %v1795_v54 = vld [vmem:[%s2290_s11 + $0x20] sm:$0xff]  }
 0xa9a   : > { %v1682_v56 = vpop.f32.mrb[11].mxu0  ;;  %1686 = vmatmul.mubr.msk.bf16.vlgmr.msra.gmra.mrb[24].mxu1 %vm600_vm2, %v1023_v53  ;;  %v1794_v53 = vld [vmem:[%s2290_s11 + $0x18] sm:$0xff]   ;;  %v1796_v55 = vld [vmem:[%s2290_s11 + $0x28] sm:$0xff]  }
 0xa9b   : > { %1697 = vmatprep.mubr.msk.bf16.mxu1 %vm1886_vm1, %v1885_v8  ;;  %v1797_v56 = vld [vmem:[%s2290_s11 + $0x30] sm:$0xff]  }
 0xa9f   : > { %v1115_v57 = vpop.f32.mrb[12].mxu0 }
 0xaa0   : > { %v1693_v58 = vpop.f32.mrb[13].mxu0  ;;  %v1121_v59 = vsel %vm600_vm2, %v1115_v57, -inf }
 0xaa1   : > { %1122 = vmax.xlane.f32.xlu1 %v1121_v59  ;;  %v1118_v60 = vpop.f32.mrb[14].mxu0  ;;  %v1570_v58 = vld [vmem:[%s2289_s10] ss:$0 sm:$0xff] }
 0xaa2   : > { %v1694_v61 = vpop.f32.mrb[15].mxu0 }
 0xab2   : > { %1133 = vrot.lane.b32.xlu1 %v2064_v25, %s1897_s16  ;;  %v1186_v25 = vsel %vm664_vm3, %v596_v6, 0  ;;  %v1574_v6 = vld [vmem:[%s2291_s12] ss:$0 sm:$0xff]  ;;  %s1827_s16 = scalar_lea.vmem %s1826_s30, 256 }
 0xab3   : > { %1702 = vmatpush3.bf16.msra.mxu0 %v1186_v25  ;;  %p1829_p1 = scmp.lt.s32.totalorder %s1827_s16, %s1821_s22 }
 0xab4   : > { %1715 = vmatprep.subr.bf16.mxu0 %v1885_v8 }
 0xab5   : > { %p1830_p2 = por %p1829_p1, %p1828_p0 }
 0xab7   : > { %p1831_p3 = pnand %p1830_p2, %p1824_p13 }
 0xb2e   : > { %v1123_v62 = vpop.xlane.xlu1 %1122 }
 0xb2f   : > { %v1124_v63 = vsub.f32 %v1115_v57, %v1123_v62  ;;  %v1798_v57 = vld [vmem:[%s2290_s11 + $0x38] sm:$0xff]  }
 0xb31   : > { %v1125_v1 = vmul.f32 1.442695, %v1124_v63 }
 0xb32   : > { %v1134_v2 = vpop.permute.xlu1 %1133 }
 0xb33   : > { %1813 = vpow2.f32 %v1125_v1  ;;  %v1139_v3 = vsel %vm664_vm3, %v1134_v2, 0 }
 0xb34   : > { %1696 = vmatpush3.bf16.msra.mxu1 %v1139_v3 }
 0xb35   : > { %1707 = vmatprep.subr.bf16.mxu1 %v1885_v8 }
 0xb3d   : > { %v1814_v4 = vpop.eup %1813 }
 0xb3e   : > { %v1127_v5 = vsel %vm600_vm2, %v1814_v4, 0.0 }
 0xb3f   : > { %1128 = vadd.xlane.f32.xlu0 %v1127_v5 }
 0xb6d   : > { %v1064_v7 = vpop.f32.mrb[24].mxu1 }
 0xb6e   : > { %v1070_v9 = vadd.f32 %v1064_v7, %v2124_v29  ;;  %v1687_v10 = vpop.f32.mrb[25].mxu1  ;;  %v1583_v7 = vld [vmem:[%s2293_s14] ss:$0 sm:$0xff] }
 0xb6f   : > { %v1067_v11 = vpop.f32.mrb[26].mxu1 }
 0xb70   : > { %v1688_v12 = vpop.f32.mrb[27].mxu1 }
 0xbcc   : > { %v1129_v13 = vpop.xlane.xlu0 %1128 }
 0xbcd   : > { %1815 = vrcp.f32 %v1129_v13 }
 0xbd7   : > { %v1816_v14 = vpop.eup %1815 }
 0xbd8   : > { %v1131_v15 = vmul.f32 %v1816_v14, %v1814_v4 }
 0xbda   : > { %v1132_v16 = vpack.c.bf16 %v1131_v15, %v1131_v15 }
 0xbdc   : > { %1698 = vmatmul.mubr.msk.bf16.vlgmr.msra.gmra.mrb[28].mxu1 %vm600_vm2, %v1132_v16 }
 0xbdd   : > { %1711 = vmatprep.mubr.msk.bf16.mxu1 %vm1886_vm1, %v1885_v8  ;;  %1708 = vmatpush3.bf16.msra.mxu1 %v1789_v40 }
 0xbde   : > { %1709 = vmatprep.subr.bf16.mxu1 %v1885_v8 }
 0xcaf   : > { %v1175_v17 = vpop.f32.mrb[28].mxu1 }
 0xcb0   : > { %v1181_v18 = vpack.c.bf16 %v1175_v17, %v1175_v17  ;;  %v1699_v19 = vpop.f32.mrb[29].mxu1 }
 0xcb1   : > { %v1178_v20 = vpop.f32.mrb[30].mxu1 }
 0xcb2   : > { %v1700_v21 = vpop.f32.mrb[31].mxu1  ;;  %1704 = vmatmul.mubr.msk.bf16.vlgmr.msra.gmra.mrb[16].mxu0 %vm600_vm2, %v1181_v18 }
 0xcb3   : > { %1731 = vmatprep.mubr.msk.bf16.mxu0 %vm1886_vm1, %v1885_v8  ;;  %1716 = vmatpush3.bf16.msra.mxu0 %v1791_v41 }
 0xcb4   : > { %1717 = vmatprep.subr.bf16.mxu0 %v1885_v8 }
 0xcb7   : > { %1718 = vmatpush3.bf16.msra.mxu0 %v1792_v42 }
 0xcb8   : > { %1719 = vmatprep.subr.bf16.mxu0 %v1885_v8 }
 0xcbb   : > { %1720 = vmatpush3.bf16.msra.mxu0 %v1793_v43 }
 0xcbc   : > { %1721 = vmatprep.subr.bf16.mxu0 %v1885_v8 }
 0xcbf   : > { %1722 = vmatpush3.bf16.msra.mxu0 %v1794_v53 }
 0xcc0   : > { %1723 = vmatprep.subr.bf16.mxu0 %v1885_v8 }
 0xcc3   : > { %1724 = vmatpush3.bf16.msra.mxu0 %v1795_v54 }
 0xcc4   : > { %1725 = vmatprep.subr.bf16.mxu0 %v1885_v8 }
 0xcc7   : > { %1726 = vmatpush3.bf16.msra.mxu0 %v1796_v55 }
 0xcc8   : > { %1727 = vmatprep.subr.bf16.mxu0 %v1885_v8 }
 0xccb   : > { %1728 = vmatpush3.bf16.msra.mxu0 %v1797_v56 }
 0xccc   : > { %1729 = vmatprep.subr.bf16.mxu0 %v1885_v8 }
 0xccf   : > { %1730 = vmatpush3.bf16.msra.mxu0 %v1798_v57 }
 0xd85   : > { %v1222_v22 = vpop.f32.mrb[16].mxu0 }
 0xd86   : > { %v1228_v24 = vadd.f32 %v1222_v22, %v1070_v9  ;;  %v1705_v26 = vpop.f32.mrb[17].mxu0 }
 0xd87   : > { %v1225_v28 = vpop.f32.mrb[18].mxu0 }
 0xd88   : > { %v1236_v29 = vadd.f32 %v1566_v23, %v1228_v24  ;;  %v1706_v30 = vpop.f32.mrb[19].mxu0 }
 0xd8a   : > { %v1244_v32 = vmul.f32 %v1567_v27, %v1236_v29 }
 0xd8c   : > { %v2170_v33 = vadd.f32 %v1244_v32, %v2032_v0  ;;  %v1790_v0 = vld [vmem:[%s2288_s9 + $0x8] sm:$0xff]  }
 0xd8d   : > { %1710 = vmatpush3.bf16.msra.mxu1 %v1790_v0 }
 0xd8e   : > { %v1248_v34 = vsel %vm494_vm0, %v2170_v33, 0.0 }
 0xd8f   : > { %1249 = vadd.xlane.f32.xlu1 %v1248_v34 }
 0xe1c   : > { %v1250_v35 = vpop.xlane.xlu1 %1249 }
 0xe1d   : > { %v1251_v36 = vmul.f32 0.03125, %v1250_v35 }
 0xe1f   : > { %v1252_v37 = vsub.f32 %v2170_v33, %v1251_v36 }
 0xe21   : > { %v1253_v38 = vmul.f32 %v1252_v37, %v1252_v37 }
 0xe23   : > { %v1254_v39 = vsel %vm494_vm0, %v1253_v38, 0.0 }
 0xe24   : > { %1255 = vadd.xlane.f32.xlu0 %v1254_v39 }
 0xeb1   : > { %v1256_v44 = vpop.xlane.xlu0 %1255 }
 0xeb2   : > { %v1257_v45 = vmul.f32 0.03125, %v1256_v44 }
 0xeb4   : > { %v1258_v46 = vadd.f32 1e-05, %v1257_v45 }
 0xeb6   : > { %1817 = vrsqrt.f32 %v1258_v46 }
 0xec0   : > { %v1818_v47 = vpop.eup %1817 }
 0xec1   : > { %v1260_v49 = vmul.f32 %v1818_v47, %v1252_v37 }
 0xec3   : > { %v1267_v31 = vmul.f32 %v1568_v48, %v1260_v49 }
 0xec5   : > { %v1274_v51 = vadd.f32 %v1569_v50, %v1267_v31 }
 0xec7   : > { %v1275_v52 = vpack.c.bf16 %v1274_v51, %v1274_v51 }
 0xec9   : > { %1712 = vmatmul.mubr.msk.bf16.vlgmr.msra.gmra.mrb[32].mxu1 %vm494_vm0, %v1275_v52 }
 0xf9c   : > { %v1336_v59 = vpop.f32.mrb[32].mxu1 }
 0xf9d   : > { %v1337_v60 = vadd.f32 %v1570_v58, %v1336_v59  ;;  %v1713_v61 = vpop.f32.mrb[33].mxu1 }
 0xf9e   : > { %v1339_v62 = vpop.f32.mrb[34].mxu1 }
 0xf9f   : > { %v1343_v63 = vmul.f32 0.70710677, %v1337_v60  ;;  %v1714_v1 = vpop.f32.mrb[35].mxu1  ;;  %v1342_v8 = vmul.f32 0.5, %v1337_v60 }
 0xfa1   : > { %1819 = verf.f32 %v1343_v63 }
 0xfab   : > { %v1820_v2 = vpop.eup %1819 }
 0xfac   : > { %v1345_v3 = vadd.f32 1.0, %v1820_v2 }
 0xfae   : > { %v1346_v4 = vmul.f32 %v1345_v3, %v1342_v8 }
 0xfb0   : > { %v1347_v5 = vpack.c.bf16 %v1346_v4, %v1346_v4 }
 0xfb2   : > { %1732 = vmatmul.mubr.bf16.vlgmr.msra.gmra.mrb[20].mxu0 %v1347_v5 }
0x1085   : > { %v1453_v25 = vpop.f32.mrb[20].mxu0 }
0x1086   : > { %v1454_v9 = vadd.f32 %v1574_v6, %v1453_v25  ;;  %v1733_v10 = vpop.f32.mrb[21].mxu0 }
0x1087   : > { %v1456_v11 = vpop.f32.mrb[22].mxu0 }
0x1088   : > { %v1466_v12 = vmul.f32 %v1583_v7, %v1454_v9  ;;  %v1734_v13 = vpop.f32.mrb[23].mxu0 }
0x108a   : > { %v1467_v14 = vadd.f32 %v1466_v12, %v2170_v33 }
0x108c   : > { %1468 = vst.msk [vmem:[%s485_s23] sm:$0xff] %vm494_vm0, %v1467_v14 }
0x108d   : > { %1834 = shalt.err (!%p1831_p3)
}
0x108e   : > { %s1835_s3 = scalar_lea.hbm %s2236_s1, 128  ;;  %s1839_s17 = scalar_lea.hbm %s2294_s15, 256 }
0x108f   : > { %p1836_p4 = scmp.ne.s32.totalorder %s2236_s1, %s1835_s3  ;;  %p1840_p9 = scmp.lt.u32.totalorder %s2236_s1, %s2294_s15 }
0x1090   : > { %p1841_p10 = scmp.lt.u32.totalorder %s1839_s17, %s1835_s3  ;;  %p1843_p12 = scmp.lt.u32.totalorder %s1835_s3, %s2236_s1 }
0x1091   : > { %p1837_p7 = pnand %p1836_p4, %p2017_p5 }
0x1092   : > { %p1842_p11 = por %p1841_p10, %p1840_p9 }
0x1093   : > { %p1838_p8 = pneg %p1837_p7 }
0x1094   : > { %p1844_p13 = por %p1843_p12, %p1842_p11 }
0x1096   : > { %p1845_p0 = pnand %p1844_p13, %p1838_p8 }
0x1098   : > { %1848 = shalt.err (!%p1845_p0)
}
0x1099   : > { %1735 = dma.vmem_to_hbm [thread:$0]  (%p2017_p5), %s2238_s2, 128, %s2236_s1, %s1470_s26  }
0x109a PF: > { %p1741_p1 = scmp.ge.s32.totalorder %s1883_s21, 2  ;;  %s1495_s22 = sand.u32 1, %s1871_s18  }
0x109b   : > { %s1496_s30 = scalar_lea.sflag [#allocation3], %s1495_s22 }
0x109c   : > { %p1738_p2 = pnand %p1741_p1, %p2021_p6 }
0x109e   : > { %1866 = dma.done.wait (!%p1738_p2), %s1496_s30, 128  }
0x109f   : > { %1868 = vsyncadd (!%p1738_p2), %s1496_s30, 4294967168  ;;  %p25_p3 = scmp.ge.s32.totalorder %s2004_s24, 4   ;;  %s2307_s18 = smov %s1875_s19 }
0x10a0   : > { %s2308_s19 = smov %s1879_s20  ;;  %s2309_s20 = smov %s2015_s27 }
0x10a1   : > { %s2310_s21 = smov %s2004_s24  ;;  %27 = sbr.rel (!%p25_p3) target bundleno = 9 (0x9), region = 115 }
0x10a8   :  { %1501 = vsyncpa [#allocation3], 1 }
0x10a9   :  { %1503 = vsyncpa [#allocation3 + $0x1], 1 }

</bundles_post_ra>
